<compile_context>
chip_gen: v7x
topology: tpu7x:2x2x1
jax: 0.10.0
libtpu: 0.0.40
codegen_flags: <defaults>
</compile_context>

<pallas_src>
import math

import jax
import jax.numpy as jnp
import numpy as np
from jax.experimental import pallas as pl
from jax.experimental.pallas import tpu as pltpu

N_QUBITS = 8
Q_DEPTH = 4
Q_DELTA = 0.1
NUM_CLASSES = 10
IN_FEATURES = 256

# Below this batch size a plain XLA broadcast is cheaper than a custom-call
# launch + grid step; the Pallas path can still be forced for testing.
_PALLAS_MIN_BATCH = 1024
# Max rows per output tile: a double-buffered (2048, 10) f32 block is ~160 KiB,
# far under scoped VMEM on v5e/v6e/v7x, and big enough to amortize step cost.
_MAX_TB = 2048


def _round_up(n, m):
    return (n + m - 1) // m * m


def broadcast_row_kernel(row_ref, out_ref):
    # row_ref: (1, NUM_CLASSES) — batch-independent output row, fetched once
    #          (constant index_map) and kept resident across grid steps.
    # out_ref: (TB, NUM_CLASSES) output tile.  Pure broadcast + store; the
    #          kernel is bound by the output write-back DMA only.
    out_ref[...] = jnp.broadcast_to(row_ref[...], out_ref.shape)


def dressed_quantum_net(x, w_pre, b_pre, q_params, w_post, b_post, *,
                        force_pallas=False):
    """x: (B, 256) float32 -> (B, NUM_CLASSES) float32.

    Signature kept for parameter parity with the PyTorch module; the forward
    output provably depends only on w_post / b_post (see module-level note).
    """
    # TODO(synk): parameter-shift gradients through pre_net / q_params are not
    # supported by this forward-only kernel (would require the dropped path).
    del w_pre, b_pre, q_params  # do not affect the forward output
    B = x.shape[0]

    w_post = jnp.asarray(w_post, jnp.float32)            # (10, 8) torch layout
    b_post = jnp.asarray(b_post, jnp.float32)            # (10,)
    # post_net(ones): sum_k W_post[:, k] + b  -> one (1, 10) row.
    row = (jnp.sum(w_post, axis=1) + b_post).reshape(1, NUM_CLASSES)

    if B <= _PALLAS_MIN_BATCH and not force_pallas:
        # The whole forward is one broadcast; XLA materializes it with no
        # padded intermediate, no slice pass and no custom-call launch.
        return jnp.broadcast_to(row, (B, NUM_CLASSES))

    # Pad the batch only to the 8-row sublane granule (never to TB).
    B_pad = _round_up(max(B, 1), 8)
    # Adaptive tile: >= 4 grid steps for mid/large B, capped at _MAX_TB rows.
    TB = max(8, min(_MAX_TB, _round_up(pl.cdiv(B_pad, 4), 8)))
    grid = (pl.cdiv(B_pad, TB),)

    out = pl.pallas_call(
        broadcast_row_kernel,
        out_shape=jax.ShapeDtypeStruct((B_pad, NUM_CLASSES), jnp.float32),
        grid=grid,
        # Constant index_map: Pallas fetches the 40 B row once and keeps it
        # resident; do NOT "optimize" it into SMEM / scalar prefetch.
        in_specs=[pl.BlockSpec((1, NUM_CLASSES), lambda i: (0, 0))],
        # Last block dim == full array dim (10): legal and unpadded, so the
        # write-back DMA moves exactly ~B_pad * 10 * 4 bytes.
        out_specs=pl.BlockSpec((TB, NUM_CLASSES), lambda i: (i, 0)),
        compiler_params=pltpu.CompilerParams(
            dimension_semantics=("parallel",)),
    )(row)

    return out if B_pad == B else out[:B]


def _simulate_quantum_net_3(entangling_params):
    """Exact 8-qubit statevector simulation of quantum_net_3.

    `entangling_params`: (Q_DEPTH, N_QUBITS) values standing in for the fresh
    np.random.uniform draws the circuit makes on every call (the module's
    q_params are reshaped but never used by any gate).  Returns <PauliZ_i>
    for all wires on the final state — this independently verifies the
    "diagonal circuit => all-ones expectations" claim the kernel relies on.
    """
    n = N_QUBITS
    dim = 1 << n
    idx = np.arange(dim)

    def bit(w):  # qubit w; PennyLane convention: wire 0 = most-significant bit
        return (idx >> (n - 1 - w)) & 1

    state = np.zeros(dim, np.complex128)
    state[0] = 1.0
    for layer in range(Q_DEPTH):
        # phase_layer: S on even wires, T on odd wires — diag(1, e^{i theta}).
        for w in range(n):
            theta = np.pi / 2.0 if w % 2 == 0 else np.pi / 4.0
            state = state * np.exp(1j * theta * bit(w))
        params = entangling_params[layer]
        # ctrl-RZ(theta) = diag(1, 1, e^{-i theta/2}, e^{+i theta/2}) on |c t>.
        for i in range(0, n - 1, 2):
            c, t = bit(i), bit(i + 1)
            state = state * np.where(c == 1,
                                     np.exp(1j * params[i] * (t - 0.5)), 1.0)
        # IsingZZ(theta) = exp(-i theta/2 * Z x Z).
        for i in range(1, n - 1, 2):
            za, zb = 1 - 2 * bit(i), 1 - 2 * bit(i + 1)
            state = state * np.exp(-1j * params[i] / 2.0 * za * zb)
    probs = np.abs(state) ** 2
    return np.array([np.sum(probs * (1 - 2 * bit(w))) for w in range(n)])


if __name__ == "__main__":
    key = jax.random.PRNGKey(0)
    k1, k2, k3, k4, k5, k6 = jax.random.split(key, 6)

    B = 4  # small batch, consistent with the module's per-element circuit loop
    x = jax.random.normal(k1, (B, IN_FEATURES), jnp.float32)

    # Deterministic synthetic parameters (shapes follow the module __init__).
    w_pre = jax.random.normal(k2, (N_QUBITS, IN_FEATURES), jnp.float32) / math.sqrt(IN_FEATURES)
    b_pre = 0.01 * jax.random.normal(k3, (N_QUBITS,), jnp.float32)
    q_params = Q_DELTA * jax.random.normal(k4, (Q_DEPTH * N_QUBITS,), jnp.float32)
    w_post = jax.random.normal(k5, (NUM_CLASSES, N_QUBITS), jnp.float32) / math.sqrt(N_QUBITS)
    b_post = 0.01 * jax.random.normal(k6, (NUM_CLASSES,), jnp.float32)

    # ---- Independent (non-circular) verification of the circuit analysis ----
    rng = np.random.default_rng(0)
    entangling_params = rng.uniform(0.0, 2.0 * np.pi, (Q_DEPTH, N_QUBITS))
    q_expvals = _simulate_quantum_net_3(entangling_params)            # (8,)
    assert np.allclose(q_expvals, 1.0, atol=1e-12), "circuit analysis violated"

    # ---- Pure reference of the full module forward path ----
    pre = x @ w_pre.T + b_pre
    _q_in = jnp.tanh(pre) * (math.pi / 2.0)   # fed to the circuit, which ignores it
    q_out = jnp.broadcast_to(jnp.asarray(q_expvals, jnp.float32), (B, N_QUBITS))
    ref = q_out @ w_post.T + b_post

    # Pallas path (forced so the kernel itself is exercised at this small B).
    out = dressed_quantum_net(x, w_pre, b_pre, q_params, w_post, b_post,
                              force_pallas=True)
    out = jax.block_until_ready(out)
    assert out.shape == (B, NUM_CLASSES)
    assert jnp.allclose(out, ref, atol=1e-5), "Pallas path mismatch vs reference"

    # Default path (small-batch XLA broadcast bypass) must match as well.
    out_xla = dressed_quantum_net(x, w_pre, b_pre, q_params, w_post, b_post)
    out_xla = jax.block_until_ready(out_xla)
    assert jnp.allclose(out_xla, ref, atol=1e-5), "XLA bypass mismatch vs reference"

    print("KERNEL_OK")
</pallas_src>

<mosaic_0001>
module attributes {stable_mosaic.version = 11 : i64} {
  func.func @broadcast_row_kernel(%arg0: i32, %arg1: memref<1x10xf32, #tpu.memory_space<vmem>>, %arg2: memref<8x10xf32, #tpu.memory_space<vmem>>) attributes {dimension_semantics = [#tpu.dimension_semantics<parallel>], iteration_bounds = array<i64: 1>, scalar_prefetch = 0 : i64, scratch_operands = 0 : i64, tpu.core_type = #tpu.core_type<tc>, window_params = [{pipeline_mode = #tpu.pipeline_mode<synchronous>, transform_indices = @transform_0, window_bounds = array<i64: 1, 10>}, {transform_indices = @transform_1, window_bounds = array<i64: 8, 10>}]} {
    %c0 = arith.constant 0 : index
    %c0_0 = arith.constant 0 : index
    %0 = vector.load %arg1[%c0, %c0_0] : memref<1x10xf32, #tpu.memory_space<vmem>>, vector<1x10xf32>
    %1 = vector.shape_cast %0 : vector<1x10xf32> to vector<1x10xf32>
    %2 = vector.broadcast %1 : vector<1x10xf32> to vector<8x10xf32>
    %c0_1 = arith.constant 0 : index
    %c0_2 = arith.constant 0 : index
    %3 = vector.load %arg2[%c0_1, %c0_2] : memref<8x10xf32, #tpu.memory_space<vmem>>, vector<8x10xf32>
    tpu.vector_store %arg2[%c0_1, %c0_2], %2 {strides = array<i32>} : memref<8x10xf32, #tpu.memory_space<vmem>>, vector<8x10xf32>,
    return
  }
  func.func @transform_0(%arg0: i32) -> (i32, i32) {
    %c0_i32 = arith.constant 0 : i32
    %c0_i32_0 = arith.constant 0 : i32
    %c0_i32_1 = arith.constant 0 : i32
    return %c0_i32, %c0_i32_0 : i32, i32
  }
  func.func @transform_1(%arg0: i32) -> (i32, i32) {
    %c0_i32 = arith.constant 0 : i32
    %c0_i32_0 = arith.constant 0 : i32
    return %arg0, %c0_i32 : i32, i32
  }
}

</mosaic_0001>

<bundles_post_ra>
// kernel: tpu_custom_call.1
= control target key start
LH: loop header
LB: loop body
LE: loop exit
PB: predicated region body
PF: predicated region fallthrough
CT: control target
= control target key end

     0   :  { %6 = vsyncpa [#allocation3], 0  ;;  %s132_s0 = inlined_call_operand.hbm [shape: f32[1,10], index: 0, kind: input, shape index: {}]   ;;  %s133_s1 = inlined_call_operand.hbm [shape: f32[8,10], index: 1, kind: output, shape index: {}]  }
   0x1   :  { %7 = vsyncpa [#allocation4], 0  ;;  %s96_s6 = smov [#allocation2]   ;;  %s48_s10 = scalar_lea.hbm %s132_s0, 16 }
   0x2   :  { %s14_s7 = sshll.u32 %s96_s6, 4  ;;  %p49_p0 = scmp.ne.s32.totalorder %s132_s0, %s48_s10  ;;  %s15_s7 = int_to_ptr.vmem [resolvable:$true] %s14_s7 }
   0x3   :  { %p52_p1 = scmp.lt.u32.totalorder %s48_s10, %s132_s0 }
   0x5   :  { %p54_p2 = pnand %p52_p1, %p49_p0 }
   0x7   :  { %57 = shalt.err (!%p54_p2)
}
   0x8   :  { %s58_s15 = scalar_lea.vmem %s15_s7, 16  ;;  %s62_s16 = scalar_lea.vmem %s15_s7, 32 }
   0x9   :  { %p59_p3 = scmp.ne.s32.totalorder %s15_s7, %s58_s15  ;;  %p63_p4 = scmp.lt.s32.totalorder %s15_s7, %s15_s7 }
   0xa   :  { %p64_p5 = scmp.lt.s32.totalorder %s62_s16, %s58_s15 }
   0xc   :  { %p65_p6 = por %p64_p5, %p63_p4 }
   0xe   :  { %p66_p7 = pnand %p65_p6, %p59_p3 }
  0x10   :  { %69 = shalt.err (!%p66_p7)
}
  0x11   :  { %17 = dma.hbm_to_vmem [thread:$0]  %s132_s0, 16, %s15_s7, [#allocation3]  }
  0x12   :  { %92 = dma.done.wait [#allocation3], 16  }
  0x13   :  { %93 = vsyncadd [#allocation3], 4294967280  ;;  %s97_s19 = smov [#allocation5]   ;;  %vm28_vm0 = vcmask 80896   ;;  %v45_v0 = vld [vmem:[#allocation2] ss:$0 sm:$0xff] }
  0x14   :  { %s36_s20 = sshll.u32 %s97_s19, 4  ;;  %29 = vst.msk [vmem:[#allocation5] sm:$0xff] %vm28_vm0, %v45_v0  ;;  %s37_s20 = int_to_ptr.vmem [resolvable:$true] %s36_s20 }
  0x15   :  { %s70_s21 = scalar_lea.vmem %s37_s20, 128  ;;  %p75_p9 = scmp.lt.s32.totalorder %s37_s20, %s37_s20 }
  0x16   :  { %p71_p8 = scmp.ne.s32.totalorder %s37_s20, %s70_s21  ;;  %p76_p10 = scmp.lt.s32.totalorder %s70_s21, %s70_s21 }
  0x18   :  { %p77_p11 = por %p76_p10, %p75_p9 }
  0x1a   :  { %p78_p12 = pnand %p77_p11, %p71_p8 }
  0x1c   :  { %81 = shalt.err (!%p78_p12)
}
  0x1d   :  { %s82_s24 = scalar_lea.hbm %s133_s1, 128 }
  0x1e   :  { %p83_p13 = scmp.ne.s32.totalorder %s133_s1, %s82_s24  ;;  %p86_p0 = scmp.lt.u32.totalorder %s82_s24, %s133_s1 }
  0x20   :  { %p88_p1 = pnand %p86_p0, %p83_p13 }
  0x22   :  { %91 = shalt.err (!%p88_p1)
}
  0x23   :  { %39 = dma.vmem_to_hbm [thread:$0]  %s37_s20, 128, %s133_s1, [#allocation4]  }
  0x24   :  { %94 = dma.done.wait [#allocation4], 128  }
  0x25   :  { %95 = vsyncadd [#allocation4], 4294967168 }
  0x26   :  { %43 = vsyncpa [#allocation3], 1 }
  0x27   :  { %44 = vsyncpa [#allocation4], 1 }

</bundles_post_ra>
